<compile_context>
chip_gen: v6e
topology: v6e:2x2x1
jax: 0.10.0
libtpu: 0.0.40
codegen_flags: <defaults>
</compile_context>

<pallas_src>
import jax
import jax.numpy as jnp
from jax.experimental import pallas as pl
from jax.experimental.pallas import tpu as pltpu


# --------------------------------------------------------------------------
# Hardware / tiling heuristics
# --------------------------------------------------------------------------

def _vmem_capacity_bytes():
    """Trace-time VMEM capacity; conservative (v7x-sized) default if unknown."""
    try:
        return int(pltpu.get_tpu_info().vmem_capacity_bytes)
    except Exception:
        return 64 * 1024 * 1024


def _pick_block_batch(B, C, HW, itemsize, budget_bytes):
    """Pick the batch tile Bt (a divisor of B) for the single-pass kernel.

    Returns None when even Bt=1 does not fit `budget_bytes` (double-buffered
    x1/x2/out blocks) -- the caller then uses the channel-tiled two-pass path.
    """
    per_b_set = 3 * C * HW * itemsize       # x1 + x2 + out blocks (one buffer each)
    per_b_pipe = 2 * per_b_set              # double-buffered by the pipeline
    if per_b_pipe > budget_bytes:
        return None
    divisors = [d for d in range(1, B + 1) if B % d == 0]
    feasible = [d for d in divisors if d * per_b_pipe <= budget_bytes]
    # Keep enough grid steps for pipeline overlap and (v7x) megacore sharding.
    min_steps = 4 if B >= 4 else (2 if B >= 2 else 1)
    stepped = [d for d in feasible if B // d >= min_steps] or [feasible[0]]
    # ~4 MiB of block data already saturates the HBM roofline; bigger tiles only
    # remove pipeline depth.  Prefer an even number of grid steps (v7x: 2 TCs).
    target = 4 * 1024 * 1024
    big_enough = [d for d in stepped if d * per_b_set >= target]
    pool = big_enough or stepped
    even = [d for d in pool if (B // d) % 2 == 0]
    pool = even or pool
    return min(pool) if big_enough else max(pool)


def _pick_channel_tile(B, C, HWp, itemsize, budget_bytes):
    """Channel tile for the two-pass fallback: a divisor of C that is a
    multiple of 128 (or C itself), sized so two double-buffered (B, TC, HWp)
    blocks fit the budget."""
    cands = [c for c in range(128, C, 128) if C % c == 0] + [C]
    per_c_set = 2 * B * HWp * itemsize       # two big blocks per channel
    per_c_pipe = 2 * per_c_set               # double-buffered
    feasible = [c for c in cands if c * per_c_pipe <= budget_bytes]
    if not feasible:
        # TODO(synk): also tile the batch / spatial axes when even a 128-channel
        # block set exceeds the VMEM budget (extreme B*H*W).
        return cands[0]
    target = 4 * 1024 * 1024
    big = [c for c in feasible if c * per_c_set >= target]
    return min(big) if big else max(feasible)


# --------------------------------------------------------------------------
# Single-pass kernel (default path)
# --------------------------------------------------------------------------

def _make_se_kernel(hw):
    """SE kernel; `hw` is the true (unpadded) spatial size H*W."""
    inv_hw = 1.0 / float(hw)

    def _se_kernel(x1_ref, x2_ref, w1_ref, w2_ref, o_ref):
        # x1_ref, x2_ref, o_ref: (Bt, C, HWp)   w1_ref: (C, Cr)   w2_ref: (Cr, C)
        # squeeze: global average pool, accumulated in f32 (any zero-padded
        # tail sums to 0; divide by the true HW).
        s = (jnp.sum(x1_ref[...], axis=-1, dtype=jnp.float32)
             + jnp.sum(x2_ref[...], axis=-1, dtype=jnp.float32)) * inv_hw  # (Bt, C)

        # excitation: Linear -> ReLU -> Linear -> Sigmoid (bias-free).
        h = jnp.maximum(
            jnp.dot(s, w1_ref[...], preferred_element_type=jnp.float32), 0.0)
        y = jax.nn.sigmoid(
            jnp.dot(h, w2_ref[...], preferred_element_type=jnp.float32))      # (Bt, C)

        # channel-wise re-weighting; re-read x1_ref so the epilogue streams
        # directly from the resident input buffer (no long live range).
        o_ref[...] = (x1_ref[...] * y.astype(o_ref.dtype)[:, :, None]).astype(o_ref.dtype)

    return _se_kernel


# --------------------------------------------------------------------------
# Two-pass fallback (channel-tiled squeeze, XLA excite, channel-tiled scale)
# --------------------------------------------------------------------------

def _squeeze_excite_two_pass(x1f, x2f, w1, w2, hw, budget_bytes, vmem_limit):
    B, C, HWp = x1f.shape
    itemsize = x1f.dtype.itemsize
    TC = _pick_channel_tile(B, C, HWp, itemsize, budget_bytes)
    nC = C // TC
    inv_hw = 1.0 / float(hw)

    def _squeeze_kernel(x1_ref, x2_ref, s_ref):
        # x1_ref, x2_ref: (B, TC, HWp); s_ref: (B, TC) f32
        s_ref[...] = (jnp.sum(x1_ref[...], axis=-1, dtype=jnp.float32)
                      + jnp.sum(x2_ref[...], axis=-1, dtype=jnp.float32)) * inv_hw

    s = pl.pallas_call(
        _squeeze_kernel,
        out_shape=jax.ShapeDtypeStruct((B, C), jnp.float32),
        grid_spec=pltpu.PrefetchScalarGridSpec(
            num_scalar_prefetch=0,
            grid=(nC,),
            in_specs=[pl.BlockSpec((B, TC, HWp), lambda c: (0, c, 0)),
                      pl.BlockSpec((B, TC, HWp), lambda c: (0, c, 0))],
            out_specs=pl.BlockSpec((B, TC), lambda c: (0, c)),
        ),
        compiler_params=pltpu.CompilerParams(
            dimension_semantics=("parallel",),
            vmem_limit_bytes=vmem_limit,
        ),
    )(x1f, x2f)

    # Excitation on the tiny (B, C) descriptor: plain XLA is plenty here.
    y = jax.nn.sigmoid(
        jnp.maximum(s @ w1.astype(jnp.float32), 0.0) @ w2.astype(jnp.float32))

    def _scale_kernel(x1_ref, y_ref, o_ref):
        o_ref[...] = (x1_ref[...]
                      * y_ref[...].astype(o_ref.dtype)[:, :, None]).astype(o_ref.dtype)

    return pl.pallas_call(
        _scale_kernel,
        out_shape=jax.ShapeDtypeStruct((B, C, HWp), x1f.dtype),
        grid_spec=pltpu.PrefetchScalarGridSpec(
            num_scalar_prefetch=0,
            grid=(nC,),
            in_specs=[pl.BlockSpec((B, TC, HWp), lambda c: (0, c, 0)),
                      pl.BlockSpec((B, TC), lambda c: (0, c))],
            out_specs=pl.BlockSpec((B, TC, HWp), lambda c: (0, c, 0)),
        ),
        compiler_params=pltpu.CompilerParams(
            dimension_semantics=("parallel",),
            vmem_limit_bytes=vmem_limit,
        ),
    )(x1f, y)


# --------------------------------------------------------------------------
# Public wrapper
# --------------------------------------------------------------------------

def squeeze_excitation_modulation(x1, x2, w1, w2):
    """x1, x2: (B, C, H, W); w1: (C, C//r); w2: (C//r, C). Returns (B, C, H, W)."""
    B, C, H, W = x1.shape
    Cr = w1.shape[1]
    HW = H * W
    itemsize = x1.dtype.itemsize

    # A full-extent (possibly ragged) last dim is legal and avoids the pad/slice
    # HBM copies; only pad for HW < 128 to keep output stores lane-dense.
    HWp = HW if HW >= 128 else 128
    x1f = x1.reshape(B, C, HW)
    x2f = x2.reshape(B, C, HW)
    if HWp != HW:
        pad = ((0, 0), (0, 0), (0, HWp - HW))
        x1f = jnp.pad(x1f, pad)
        x2f = jnp.pad(x2f, pad)

    vmem_cap = _vmem_capacity_bytes()
    budget = int(vmem_cap * 0.45)          # block-buffer budget (double-buffered)
    vmem_limit = int(vmem_cap * 3 // 4)    # scoped VMEM limit for the compiler

    Bt = _pick_block_batch(B, C, HWp, itemsize, budget)
    if Bt is None:
        # Single-batch whole-map block does not fit VMEM (e.g. v7x, huge C*H*W).
        out = _squeeze_excite_two_pass(x1f, x2f, w1, w2, HW, budget, vmem_limit)
    else:
        grid = (B // Bt,)
        cost = pl.CostEstimate(
            flops=4 * B * C * Cr + 2 * B * C * HW,
            transcendentals=B * C,
            bytes_accessed=3 * B * C * HW * itemsize,
        )
        out = pl.pallas_call(
            _make_se_kernel(HW),
            out_shape=jax.ShapeDtypeStruct((B, C, HWp), x1.dtype),
            grid_spec=pltpu.PrefetchScalarGridSpec(
                num_scalar_prefetch=0,
                grid=grid,
                in_specs=[
                    pl.BlockSpec((Bt, C, HWp), lambda b: (b, 0, 0)),
                    pl.BlockSpec((Bt, C, HWp), lambda b: (b, 0, 0)),
                    pl.BlockSpec((C, Cr), lambda b: (0, 0)),
                    pl.BlockSpec((Cr, C), lambda b: (0, 0)),
                ],
                out_specs=pl.BlockSpec((Bt, C, HWp), lambda b: (b, 0, 0)),
            ),
            compiler_params=pltpu.CompilerParams(
                dimension_semantics=("parallel",),
                vmem_limit_bytes=vmem_limit,
            ),
            cost_estimate=cost,
        )(x1f, x2f, w1, w2)

    if HWp != HW:
        out = out[:, :, :HW]
    return out.reshape(B, C, H, W)


def _reference(x1, x2, w1, w2):
    s = jnp.mean(x1 + x2, axis=(2, 3))          # (B, C)
    h = jnp.maximum(s @ w1, 0.0)                # (B, Cr)
    y = jax.nn.sigmoid(h @ w2)                  # (B, C)
    return x1 * y[:, :, None, None]


if __name__ == "__main__":
    # Small shapes consistent with the module (channel_size=C, reduction_ratio=16)
    B, C, H, W = 2, 64, 16, 16
    reduction_ratio = 16
    Cr = C // reduction_ratio

    key = jax.random.PRNGKey(0)
    k1, k2, k3, k4 = jax.random.split(key, 4)

    x1 = jax.random.normal(k1, (B, C, H, W), dtype=jnp.float32)
    x2 = jax.random.normal(k2, (B, C, H, W), dtype=jnp.float32)

    # Deterministic parameter init (nn.Linear weights, bias=False).
    # PyTorch Linear stores weight as (out, in) and computes x @ W.T;
    # here they are kept pre-transposed: w1: (C, Cr), w2: (Cr, C).
    w1 = (jax.random.uniform(k3, (C, Cr), dtype=jnp.float32) - 0.5) * 2.0 / jnp.sqrt(C)
    w2 = (jax.random.uniform(k4, (Cr, C), dtype=jnp.float32) - 0.5) * 2.0 / jnp.sqrt(Cr)

    out = squeeze_excitation_modulation(x1, x2, w1, w2)
    jax.block_until_ready(out)

    ref = _reference(x1, x2, w1, w2)
    assert out.shape == (B, C, H, W)
    # NOTE: for bf16 inputs the sigmoid gate is rounded to bf16 by design;
    # loosen tolerance accordingly.  f32 here.
    assert jnp.allclose(out, ref, atol=1e-5, rtol=1e-5)

    print("KERNEL_OK")
</pallas_src>

<mosaic_0001>
module attributes {stable_mosaic.version = 11 : i64} {
  func.func @_se_kernel(%arg0: i32, %arg1: memref<1x64x256xf32, #tpu.memory_space<vmem>>, %arg2: memref<1x64x256xf32, #tpu.memory_space<vmem>>, %arg3: memref<64x4xf32, #tpu.memory_space<vmem>>, %arg4: memref<4x64xf32, #tpu.memory_space<vmem>>, %arg5: memref<1x64x256xf32, #tpu.memory_space<vmem>>) attributes {dimension_semantics = [#tpu.dimension_semantics<parallel>], iteration_bounds = array<i64: 2>, scalar_prefetch = 0 : i64, scratch_operands = 0 : i64, tpu.core_type = #tpu.core_type<tc>, window_params = [{transform_indices = @transform_0, window_bounds = array<i64: 1, 64, 256>}, {transform_indices = @transform_1, window_bounds = array<i64: 1, 64, 256>}, {pipeline_mode = #tpu.pipeline_mode<synchronous>, transform_indices = @transform_2, window_bounds = array<i64: 64, 4>}, {pipeline_mode = #tpu.pipeline_mode<synchronous>, transform_indices = @transform_3, window_bounds = array<i64: 4, 64>}, {transform_indices = @transform_4, window_bounds = array<i64: 1, 64, 256>}]} {
    %c0 = arith.constant 0 : index
    %c0_0 = arith.constant 0 : index
    %c0_1 = arith.constant 0 : index
    %0 = vector.load %arg1[%c0, %c0_0, %c0_1] : memref<1x64x256xf32, #tpu.memory_space<vmem>>, vector<1x64x256xf32>
    %cst = arith.constant dense<0.000000e+00> : vector<1x64xf32>
    %1 = vector.multi_reduction <add>, %0, %cst [2] : vector<1x64x256xf32> to vector<1x64xf32>
    %c0_2 = arith.constant 0 : index
    %c0_3 = arith.constant 0 : index
    %c0_4 = arith.constant 0 : index
    %2 = vector.load %arg2[%c0_2, %c0_3, %c0_4] : memref<1x64x256xf32, #tpu.memory_space<vmem>>, vector<1x64x256xf32>
    %cst_5 = arith.constant dense<0.000000e+00> : vector<1x64xf32>
    %3 = vector.multi_reduction <add>, %2, %cst_5 [2] : vector<1x64x256xf32> to vector<1x64xf32>
    %4 = arith.addf %1, %3 : vector<1x64xf32>
    %cst_6 = arith.constant 3.906250e-03 : f32
    %5 = vector.broadcast %cst_6 : f32 to vector<1x64xf32>
    %6 = arith.mulf %4, %5 : vector<1x64xf32>
    %c0_7 = arith.constant 0 : index
    %c0_8 = arith.constant 0 : index
    %7 = vector.load %arg3[%c0_7, %c0_8] : memref<64x4xf32, #tpu.memory_space<vmem>>, vector<64x4xf32>
    %cst_9 = arith.constant dense<0.000000e+00> : vector<1x4xf32>
    %8 = tpu.matmul %6, %7, %cst_9 {dimension_numbers = #tpu.dot_dimension_numbers<[1], [0], [0], [1], [0, 0, 1, 1], [], []>} : vector<1x64xf32>, vector<64x4xf32>, vector<1x4xf32> -> vector<1x4xf32>
    %cst_10 = arith.constant 0.000000e+00 : f32
    %9 = vector.broadcast %cst_10 : f32 to vector<1x4xf32>
    %10 = arith.maximumf %8, %9 : vector<1x4xf32>
    %c0_11 = arith.constant 0 : index
    %c0_12 = arith.constant 0 : index
    %11 = vector.load %arg4[%c0_11, %c0_12] : memref<4x64xf32, #tpu.memory_space<vmem>>, vector<4x64xf32>
    %cst_13 = arith.constant dense<0.000000e+00> : vector<1x64xf32>
    %12 = tpu.matmul %10, %11, %cst_13 {dimension_numbers = #tpu.dot_dimension_numbers<[1], [0], [0], [1], [0, 0, 1, 1], [], []>} : vector<1x4xf32>, vector<4x64xf32>, vector<1x64xf32> -> vector<1x64xf32>
    %13 = arith.negf %12 : vector<1x64xf32>
    %14 = math.exp %13 : vector<1x64xf32>
    %cst_14 = arith.constant 1.000000e+00 : f32
    %15 = vector.broadcast %cst_14 : f32 to vector<1x64xf32>
    %16 = arith.addf %15, %14 : vector<1x64xf32>
    %17 = arith.divf %15, %16 : vector<1x64xf32>
    %c0_15 = arith.constant 0 : index
    %c0_16 = arith.constant 0 : index
    %c0_17 = arith.constant 0 : index
    %18 = vector.load %arg1[%c0_15, %c0_16, %c0_17] : memref<1x64x256xf32, #tpu.memory_space<vmem>>, vector<1x64x256xf32>
    %19 = vector.shape_cast %17 : vector<1x64xf32> to vector<1x64x1xf32>
    %20 = vector.broadcast %19 : vector<1x64x1xf32> to vector<1x64x256xf32>
    %21 = arith.mulf %18, %20 : vector<1x64x256xf32>
    %c0_18 = arith.constant 0 : index
    %c0_19 = arith.constant 0 : index
    %c0_20 = arith.constant 0 : index
    %22 = vector.load %arg5[%c0_18, %c0_19, %c0_20] : memref<1x64x256xf32, #tpu.memory_space<vmem>>, vector<1x64x256xf32>
    tpu.vector_store %arg5[%c0_18, %c0_19, %c0_20], %21 {strides = array<i32>} : memref<1x64x256xf32, #tpu.memory_space<vmem>>, vector<1x64x256xf32>,
    return
  }
  func.func @transform_0(%arg0: i32) -> (i32, i32, i32) {
    %c0_i32 = arith.constant 0 : i32
    %c0_i32_0 = arith.constant 0 : i32
    %c0_i32_1 = arith.constant 0 : i32
    return %arg0, %c0_i32, %c0_i32_0 : i32, i32, i32
  }
  func.func @transform_1(%arg0: i32) -> (i32, i32, i32) {
    %c0_i32 = arith.constant 0 : i32
    %c0_i32_0 = arith.constant 0 : i32
    %c0_i32_1 = arith.constant 0 : i32
    return %arg0, %c0_i32, %c0_i32_0 : i32, i32, i32
  }
  func.func @transform_2(%arg0: i32) -> (i32, i32) {
    %c0_i32 = arith.constant 0 : i32
    %c0_i32_0 = arith.constant 0 : i32
    %c0_i32_1 = arith.constant 0 : i32
    return %c0_i32, %c0_i32_0 : i32, i32
  }
  func.func @transform_3(%arg0: i32) -> (i32, i32) {
    %c0_i32 = arith.constant 0 : i32
    %c0_i32_0 = arith.constant 0 : i32
    %c0_i32_1 = arith.constant 0 : i32
    return %c0_i32, %c0_i32_0 : i32, i32
  }
  func.func @transform_4(%arg0: i32) -> (i32, i32, i32) {
    %c0_i32 = arith.constant 0 : i32
    %c0_i32_0 = arith.constant 0 : i32
    %c0_i32_1 = arith.constant 0 : i32
    return %arg0, %c0_i32, %c0_i32_0 : i32, i32, i32
  }
}

</mosaic_0001>

<bundles_post_ra>
// kernel: tpu_custom_call.1
= control target key start
LH: loop header
LB: loop body
LE: loop exit
PB: predicated region body
PF: predicated region fallthrough
CT: control target
= control target key end

     0   :  { %9 = vsyncpa [#allocation3], 0  ;;  %s1420_s0 = inlined_call_operand.hbm [shape: f32[2,64,256], index: 0, kind: input, shape index: {}]   ;;  %s1421_s1 = inlined_call_operand.hbm [shape: f32[2,64,256], index: 1, kind: input, shape index: {}]   ;;  %s1422_s2 = inlined_call_operand.vmem [shape: f32[64,4], index: 2, kind: input, shape index: {}]   ;;  %s1423_s3 = inlined_call_operand.vmem [shape: f32[4,64], index: 3, kind: input, shape index: {}]   ;;  %s1424_s4 = inlined_call_operand.hbm [shape: f32[2,64,256], index: 4, kind: output, shape index: {}]  }
   0x1   :  { %11 = vsyncpa [#allocation3 + $0x1], 0 }
   0x2   :  { %12 = vsyncpa [#allocation6], 0 }
   0x3   :  { %14 = vsyncpa [#allocation6 + $0x1], 0 }
   0x4   :  { %15 = vsyncpa [#allocation4], 0 }
   0x5   :  { %17 = vsyncpa [#allocation4 + $0x1], 0  ;;  %s1040_s15 = smov 0   ;;  %s1042_s16 = smov 0  }
   0x6   :  { %s1044_s17 = smov 0   ;;  %s1046_s18 = smov 0  }
   0x7 LB: > { %s1061_s19 = sadd.s32 4294967295, %s1004_s18   ;;  %s759_s20 = sadd.s32 4294967294, %s1004_s18   ;;  %s1004_s18 = sphi %s1046_s18, %s1440_s18   ;;  %s1000_s17 = sphi %s1044_s17, %s1439_s17   ;;  %s996_s16 = sphi %s1042_s16, %s1438_s16   ;;  %s992_s15 = sphi %s1040_s15, %s1437_s15  }
   0x8   : > { %s1065_s21 = sadd.s32 1, %s1004_s18   ;;  %s30_s22 = sadd.s32 1, %s1000_s17 }
   0x9   : > { %s27_s23 = ssub.s32 %s1004_s18, %s1065_s21  ;;  %p37_p0 = scmp.ne.s32.totalorder %s1000_s17, %s996_s16 }
   0xa   : > { %p28_p1 = scmp.eq.s32.totalorder %s27_s23, 0  ;;  %p38_p2 = scmp.eq.s32.totalorder %s1004_s18, 0 }
   0xb   : > { %p43_p3 = scmp.ne.s32.totalorder %s996_s16, %s992_s15  ;;  %p44_p4 = scmp.eq.s32.totalorder %s1061_s19, 0 }
   0xc   : > { %s1077_s24 = scalar_select %p28_p1, %s1000_s17, %s30_s22  }
   0xd   : > { %p1079_p5 = por %p38_p2, %p37_p0  ;;  %p1083_p6 = por %p44_p4, %p43_p3 }
   0xe   : > { %p135_p7 = scmp.eq.s32.totalorder %s1061_s19, 1  ;;  %p141_p8 = scmp.eq.s32.totalorder %s759_s20, 1 }
   0xf   : > { %s1428_s26 = scalar_select %p1083_p6, 1, 0 }
  0x10   : > { %p836_p10 = scmp.lt.s32.totalorder %s1004_s18, 2  ;;  %p1090_p11 = por %p135_p7, %p37_p0 }
  0x11   : > { %p1094_p12 = por %p141_p8, %p43_p3  ;;  %s1099_s29 = sand.u32 1, %s1000_s17  }
  0x12   : > { %s1429_s27 = scalar_select %p1090_p11, 1, 0 }
  0x13   : > { %s1430_s28 = scalar_select %p1094_p12, 1, 0 }
  0x14   : > { %s781_s30 = sshll.u32 %s1004_s18, 11  ;;  %s762_s5 = sshll.u32 %s1099_s29, 7 }
  0x15   : > { %s1108_s8 = scalar_lea.hbm %s1420_s0, %s781_s30  ;;  %s171_s9 = scalar_lea.vmem [#allocation2], %s762_s5 }
  0x16   : > { %s178_s10 = sshll.u32 %s171_s9, 4  ;;  %p1114_p13 = pnand %p836_p10, %p1079_p5  ;;  %s1118_s10 = int_to_ptr.vmem [resolvable:$true] %s178_s10 }
  0x17   : > { %s168_s12 = scalar_lea.sflag [#allocation3], %s1099_s29  ;;  %s880_s13 = scalar_lea.hbm %s1108_s8, 2048 }
  0x18   : > { %p881_p0 = scmp.ne.s32.totalorder %s1108_s8, %s880_s13  ;;  %p882_p1 = pneg %p1114_p13 }
  0x19   : > { %s885_s22 = scalar_lea.hbm %s1420_s0, 4096  ;;  %p886_p4 = scmp.lt.s32.totalorder %s1108_s8, %s1420_s0 }
  0x1a   : > { %p883_p2 = pnand %p882_p1, %p881_p0  ;;  %p887_p5 = scmp.lt.s32.totalorder %s885_s22, %s880_s13 }
  0x1c   : > { %p884_p3 = pneg %p883_p2  ;;  %p888_p7 = por %p887_p5, %p886_p4 }
  0x1e   : > { %p889_p8 = pnand %p888_p7, %p884_p3 }
  0x20   : > { %892 = shalt.err (!%p889_p8)
}
  0x21   : > { %s893_s6 = scalar_lea.vmem %s1118_s10, 2048  ;;  %s1006_s7 = smov [#allocation2]  }
  0x22   : > { %p894_p10 = scmp.ne.s32.totalorder %s1118_s10, %s893_s6  ;;  %s898_s9 = sshll.u32 %s1006_s7, 4  ;;  %s899_s9 = int_to_ptr.vmem [resolvable:$false] %s898_s9 }
  0x23   : > { %s900_s14 = scalar_lea.vmem %s899_s9, 4096  ;;  %p901_p9 = scmp.lt.s32.totalorder %s1118_s10, %s899_s9 }
  0x24   : > { %p896_p0 = pnand %p894_p10, %p882_p1  ;;  %p902_p12 = scmp.lt.s32.totalorder %s900_s14, %s893_s6 }
  0x26   : > { %p897_p2 = pneg %p896_p0  ;;  %p903_p11 = por %p902_p12, %p901_p9 }
  0x28   : > { %p904_p4 = pnand %p903_p11, %p897_p2 }
  0x2a   : > { %907 = shalt.err (!%p904_p4)
}
  0x2b   : > { %s1007_s13 = smov 256   ;;  %s1008_s20 = smov 16  }
  0x2c   : > { %828 = dma.hbm_to_vmem [thread:$0]  (!%p1114_p13), %s1108_s8, 2048, %s1118_s10, %s168_s12, %s1007_s13, %s1007_s13, %s1008_s20  }
  0x2d   : > { %p768_p9 = scmp.ge.s32.totalorder %s1004_s18, 1  ;;  %p207_p11 = scmp.lt.s32.totalorder %s1004_s18, 3 }
  0x2e   : > { %s1161_s6 = scalar_lea.hbm %s1421_s1, %s781_s30  ;;  %s192_s7 = scalar_lea.vmem [#allocation5], %s762_s5 }
  0x2f   : > { %p1152_p12 = pnand %p768_p9, %p207_p11  ;;  %s199_s9 = sshll.u32 %s192_s7, 4  ;;  %s1165_s9 = int_to_ptr.vmem [resolvable:$true] %s199_s9 }
  0x30   : > { %s189_s8 = scalar_lea.sflag [#allocation6], %s1099_s29  ;;  %s908_s10 = scalar_lea.hbm %s1161_s6, 2048 }
  0x31   : > { %p909_p3 = scmp.ne.s32.totalorder %s1161_s6, %s908_s10  ;;  %s913_s30 = scalar_lea.hbm %s1421_s1, 4096 }
  0x32   : > { %p914_p8 = scmp.lt.s32.totalorder %s1161_s6, %s1421_s1  ;;  %p915_p10 = scmp.lt.s32.totalorder %s913_s30, %s908_s10 }
  0x33   : > { %p911_p5 = pnand %p909_p3, %p882_p1 }
  0x34   : > { %p916_p0 = por %p915_p10, %p914_p8 }
  0x35   : > { %p912_p7 = pneg %p911_p5 }
  0x37   : > { %p917_p2 = pnand %p916_p0, %p912_p7 }
  0x39   : > { %920 = shalt.err (!%p917_p2)
}
  0x3a   : > { %s921_s29 = scalar_lea.vmem %s1165_s9, 2048  ;;  %s1009_s5 = smov [#allocation5]  }
  0x3b   : > { %p922_p4 = scmp.ne.s32.totalorder %s1165_s9, %s921_s29  ;;  %s926_s7 = sshll.u32 %s1009_s5, 4  ;;  %s927_s7 = int_to_ptr.vmem [resolvable:$false] %s926_s7 }
  0x3c   : > { %s928_s12 = scalar_lea.vmem %s927_s7, 4096  ;;  %p929_p3 = scmp.lt.s32.totalorder %s1165_s9, %s927_s7 }
  0x3d   : > { %p924_p9 = pnand %p922_p4, %p882_p1  ;;  %p930_p5 = scmp.lt.s32.totalorder %s928_s12, %s921_s29 }
  0x3f   : > { %p925_p11 = pneg %p924_p9  ;;  %p931_p6 = por %p930_p5, %p929_p3 }
  0x41   : > { %p932_p8 = pnand %p931_p6, %p925_p11 }
  0x43   : > { %935 = shalt.err (!%p932_p8)
}
  0x44   : > { %831 = dma.hbm_to_vmem [thread:$0]  (!%p1114_p13), %s1161_s6, 2048, %s1165_s9, %s189_s8, %s1007_s13, %s1007_s13, %s1008_s20  }
  0x45   : > { %211 = sbr.rel (%p1152_p12) target bundleno = 823 (0x337), region = 36  ;;  %s1196_s10 = sand.u32 (!%p1152_p12), 1, %s996_s16  }
  0x46   : > { %s1199_s14 = sshll.u32 (!%p1152_p12), %s1196_s10, 7  ;;  %s214_s30 = scalar_lea.sflag (!%p1152_p12), [#allocation3], %s1196_s10 }
  0x47   : > { %s1203_s11 = scalar_lea.vmem (!%p1152_p12), [#allocation2], %s1199_s14  ;;  %p1433_p6 = scmp.ne.s32.totalorder (!%p1152_p12), %s1428_s26, 0 }
  0x4a   : > { %979 = dma.done.wait (%p1433_p6), %s214_s30, 2048  }
  0x4b   : > { %981 = vsyncadd (%p1433_p6), %s214_s30, 4294965248  ;;  %s223_s13 = scalar_lea.sflag [#allocation6], %s1196_s10  ;;  %s1211_s20 = scalar_lea.vmem [#allocation5], %s1199_s14 }
  0x4c   : > { %983 = dma.done.wait (%p1433_p6), %s223_s13, 2048  }
  0x4d   : > { %985 = vsyncadd (%p1433_p6), %s223_s13, 4294965248  ;;  %v296_v0 = vld [vmem:[%s1211_s20] sm:$0xff]  ;;  %v297_v1 = vld [vmem:[%s1211_s20 + $0x8] sm:$0xff]  ;;  %v1010_v48 = vmov 0.0   ;;  %vm1011_vm0 = vmmov 0   ;;  %v368_v63 = vlaneseq  ;;  %vm379_vm1 = vcmask 130112  }
  0x4e   : > { %v1220_v2 = vld [vmem:[%s1203_s11] sm:$0xff]  ;;  %v312_v3 = vadd.f32 %v297_v1, %v296_v0  ;;  %v1223_v4 = vld [vmem:[%s1203_s11 + $0x8] sm:$0xff]  ;;  %v298_v5 = vld [vmem:[%s1211_s20 + $0x10] sm:$0xff]  ;;  %795 = vmatprep.subr.mxu0 %v1010_v48  ;;  %814 = vmatprep.subr.mxu1 %v1010_v48  ;;  %vm386_vm2 = vcmask 195712   ;;  %vm393_vm3 = vcmask 261312   ;;  %vm400_vm4 = vcmask 326912  }
  0x4f   : > { %v299_v6 = vld [vmem:[%s1211_s20 + $0x18] sm:$0xff]  ;;  %v272_v7 = vadd.f32 %v1223_v4, %v1220_v2  ;;  %v1230_v8 = vld [vmem:[%s1203_s11 + $0x10] sm:$0xff]  ;;  %v300_v12 = vld [vmem:[%s1211_s20 + $0x20] sm:$0xff]  ;;  %811 = vmatprep.mubr.msk.f32.mxu0 %vm1011_vm0, %v1010_v48  ;;  %816 = vmatprep.mubr.msk.f32.mxu1 %vm1011_vm0, %v1010_v48  ;;  %vm407_vm5 = vcmask 392512   ;;  %vm414_vm6 = vcmask 458112   ;;  %vm421_vm7 = vcmask 523712  }
  0x50   : > { %v1233_v9 = vld [vmem:[%s1203_s11 + $0x18] sm:$0xff]  ;;  %313 = vadd.xlane.f32.xlu1 %v312_v3  ;;  %v315_v10 = vadd.f32 %v299_v6, %v298_v5  ;;  %v301_v13 = vld [vmem:[%s1211_s20 + $0x28] sm:$0xff]  ;;  %v1240_v14 = vld [vmem:[%s1203_s11 + $0x20] sm:$0xff]  ;;  %v369_v3 = vand.u32 127, %v368_v63  ;;  %vm423_vm8 = vcmask 523264   ;;  %vm502_vm9 = vcmask 1043456  }
  0x51   : > { %273 = vadd.xlane.f32.xlu0 %v272_v7  ;;  %v275_v11 = vadd.f32 %v1233_v9, %v1230_v8  ;;  %v1243_v15 = vld [vmem:[%s1203_s11 + $0x28] sm:$0xff]  ;;  %v318_v16 = vadd.f32 %v301_v13, %v300_v12  ;;  %v302_v18 = vld [vmem:[%s1211_s20 + $0x30] sm:$0xff]  ;;  %v303_v19 = vld [vmem:[%s1211_s20 + $0x38] sm:$0xff]  ;;  %v1321_v13 = vshrl.u32 %v368_v63, 7  ;;  %vm498_vm10 = vcmask 31744   ;;  %s1340_s9 = scalar_lea.vmem [#allocation7], %s1199_s14 }
  0x52   : > { %v278_v17 = vadd.f32 %v1243_v15, %v1240_v14  ;;  %v1250_v20 = vld [vmem:[%s1203_s11 + $0x30] sm:$0xff]  ;;  %v1253_v21 = vld [vmem:[%s1203_s11 + $0x38] sm:$0xff]  ;;  %v321_v22 = vadd.f32 %v303_v19, %v302_v18  ;;  %v304_v24 = vld [vmem:[%s1211_s20 + $0x40] sm:$0xff]  ;;  %v374_v7 = vadd.s32 4294967288, %v369_v3  ;;  %s783_s14 = sshll.u32 %s1061_s19, 11  ;;  %s663_s8 = sshll.u32 %s1340_s9, 4  ;;  %s1373_s8 = int_to_ptr.vmem [resolvable:$true] %s663_s8 }
  0x53   : > { %v281_v23 = vadd.f32 %v1253_v21, %v1250_v20  ;;  %v305_v25 = vld [vmem:[%s1211_s20 + $0x48] sm:$0xff]  ;;  %v1260_v26 = vld [vmem:[%s1203_s11 + $0x40] sm:$0xff]  ;;  %v306_v30 = vld [vmem:[%s1211_s20 + $0x50] sm:$0xff]  ;;  %s1371_s29 = scalar_lea.hbm %s1424_s4, %s783_s14  ;;  %s650_s19 = scalar_lea.sflag [#allocation4], %s1196_s10 }
  0x54   : > { %316 = vadd.xlane.f32.xlu1 %v315_v10  ;;  %v1263_v27 = vld [vmem:[%s1203_s11 + $0x48] sm:$0xff]  ;;  %v324_v28 = vadd.f32 %v305_v25, %v304_v24  ;;  %v307_v31 = vld [vmem:[%s1211_s20 + $0x58] sm:$0xff]  ;;  %v1270_v32 = vld [vmem:[%s1203_s11 + $0x50] sm:$0xff]  ;;  %v402_v24 = vadd.s32 4294967256, %v369_v3  ;;  %s936_s5 = scalar_lea.vmem %s1373_s8, 2048  ;;  %p1434_p1 = scmp.ne.s32.totalorder %s1429_s27, 0 }
  0x55   : > { %276 = vadd.xlane.f32.xlu0 %v275_v11  ;;  %v284_v29 = vadd.f32 %v1263_v27, %v1260_v26  ;;  %v1273_v33 = vld [vmem:[%s1203_s11 + $0x58] sm:$0xff]  ;;  %v327_v34 = vadd.f32 %v307_v31, %v306_v30  ;;  %v308_v36 = vld [vmem:[%s1211_s20 + $0x60] sm:$0xff]  ;;  %v309_v37 = vld [vmem:[%s1211_s20 + $0x68] sm:$0xff]  ;;  %v381_v11 = vadd.s32 4294967280, %v369_v3  ;;  %p937_p13 = scmp.ne.s32.totalorder %s1373_s8, %s936_s5  ;;  %s1012_s7 = smov [#allocation7]  }
  0x56   : > { %v287_v35 = vadd.f32 %v1273_v33, %v1270_v32  ;;  %v1280_v38 = vld [vmem:[%s1203_s11 + $0x60] sm:$0xff]  ;;  %v1283_v39 = vld [vmem:[%s1203_s11 + $0x68] sm:$0xff]  ;;  %v330_v40 = vadd.f32 %v309_v37, %v308_v36  ;;  %v310_v42 = vld [vmem:[%s1211_s20 + $0x70] sm:$0xff]  ;;  %v372_v36 = vsub.s32 %v369_v3, %v1321_v13  ;;  %s940_s12 = sshll.u32 %s1012_s7, 4  ;;  %s941_s12 = int_to_ptr.vmem [resolvable:$false] %s940_s12 }
  0x57   : > { %v290_v41 = vadd.f32 %v1283_v39, %v1280_v38  ;;  %v311_v43 = vld [vmem:[%s1211_s20 + $0x78] sm:$0xff]  ;;  %v1290_v44 = vld [vmem:[%s1203_s11 + $0x70] sm:$0xff]  ;;  %v357_v51 = vld [vmem:[%s1422_s2 + $0x28] sm:$0xff]  ;;  %v384_v31 = vsub.s32 %v381_v11, %v1321_v13  ;;  %p938_p12 = pnand %p937_p13, %p1434_p1  ;;  %s942_s30 = scalar_lea.vmem %s941_s12, 4096 }
  0x58   : > { %319 = vadd.xlane.f32.xlu1 %v318_v16  ;;  %v1293_v45 = vld [vmem:[%s1203_s11 + $0x78] sm:$0xff]  ;;  %v333_v46 = vadd.f32 %v311_v43, %v310_v42  ;;  %v358_v50 = vld [vmem:[%s1422_s2 + $0x30] sm:$0xff]  ;;  %v356_v52 = vld [vmem:[%s1422_s2 + $0x20] sm:$0xff]  ;;  %p943_p10 = scmp.lt.s32.totalorder %s1373_s8, %s941_s12  ;;  %p944_p0 = scmp.lt.s32.totalorder %s942_s30, %s936_s5 }
  0x59   : > { %279 = vadd.xlane.f32.xlu0 %v278_v17  ;;  %v293_v47 = vadd.f32 %v1293_v45, %v1290_v44  ;;  %v359_v49 = vld [vmem:[%s1422_s2 + $0x38] sm:$0xff]  ;;  %v354_v54 = vld [vmem:[%s1422_s2 + $0x10] sm:$0xff]  ;;  %v353_v55 = vld [vmem:[%s1422_s2 + $0x8] sm:$0xff]  ;;  %v388_v17 = vadd.s32 4294967272, %v369_v3  ;;  %p939_p7 = pneg %p938_p12 }
  0x5a   : > { %796 = vmatpush3.msra.mxu0 %v359_v49  ;;  %v355_v53 = vld [vmem:[%s1422_s2 + $0x18] sm:$0xff]  ;;  %v352_v56 = vld [vmem:[%s1422_s2] sm:$0xff]  ;;  %p945_p2 = por %p944_p0, %p943_p10 }
  0x5b   : > { %797 = vmatprep.subr.mxu0 %v1010_v48 }
  0x5c   : > { %322 = vadd.xlane.f32.xlu1 %v321_v22  ;;  %798 = vmatpush3.msra.mxu0 %v358_v50  ;;  %v395_v22 = vadd.s32 4294967264, %v369_v3  ;;  %p946_p4 = pnand %p945_p2, %p939_p7 }
  0x5d   : > { %282 = vadd.xlane.f32.xlu0 %v281_v23  ;;  %799 = vmatprep.subr.mxu0 %v1010_v48 }
  0x5e   : > { %800 = vmatpush3.msra.mxu0 %v357_v51  ;;  %v398_v43 = vsub.s32 %v395_v22, %v1321_v13 }
  0x5f   : > { %801 = vmatprep.subr.mxu0 %v1010_v48 }
  0x60   : > { %325 = vadd.xlane.f32.xlu1 %v324_v28  ;;  %802 = vmatpush3.msra.mxu0 %v356_v52  ;;  %v377_v28 = vsub.s32 %v374_v7, %v1321_v13  ;;  %v416_v52 = vadd.s32 4294967240, %v369_v3 }
  0x61   : > { %285 = vadd.xlane.f32.xlu0 %v284_v29  ;;  %803 = vmatprep.subr.mxu0 %v1010_v48 }
  0x62   : > { %804 = vmatpush3.msra.mxu0 %v355_v53  ;;  %v419_v63 = vsub.s32 %v416_v52, %v1321_v13 }
  0x63   : > { %805 = vmatprep.subr.mxu0 %v1010_v48 }
  0x64   : > { %328 = vadd.xlane.f32.xlu1 %v327_v34  ;;  %806 = vmatpush3.msra.mxu0 %v354_v54 }
  0x65   : > { %288 = vadd.xlane.f32.xlu0 %v287_v35  ;;  %807 = vmatprep.subr.mxu0 %v1010_v48  ;;  %v409_v35 = vadd.s32 4294967248, %v369_v3 }
  0x66   : > { %808 = vmatpush3.msra.mxu0 %v353_v55 }
  0x67   : > { %809 = vmatprep.subr.mxu0 %v1010_v48  ;;  %v412_v54 = vsub.s32 %v409_v35, %v1321_v13 }
  0x68   : > { %331 = vadd.xlane.f32.xlu1 %v330_v40  ;;  %810 = vmatpush3.msra.mxu0 %v352_v56  ;;  %v391_v40 = vsub.s32 %v388_v17, %v1321_v13  ;;  %v497_v17 = vld [vmem:[%s1423_s3] sm:$0xf] }
  0x69   : > { %291 = vadd.xlane.f32.xlu0 %v290_v41  ;;  %815 = vmatpush3.msk.msra.mxu1 %vm502_vm9, %v497_v17 }
  0x6c   : > { %334 = vadd.xlane.f32.xlu1 %v333_v46 }
  0x6d   : > { %294 = vadd.xlane.f32.xlu0 %v293_v47  ;;  %v405_v47 = vsub.s32 %v402_v24, %v1321_v13 }
  0xd9   : > { %v314_v57 = vpop.xlane.xlu1 %313 }
  0xda   : > { %v274_v58 = vpop.xlane.xlu0 %273 }
  0xdb   : > { %v336_v16 = vadd.f32 %v314_v57, %v274_v58 }
  0xdd   : > { %v317_v59 = vpop.xlane.xlu1 %316  ;;  %v344_v37 = vmul.f32 0.00390625, %v336_v16 }
  0xde   : > { %v277_v60 = vpop.xlane.xlu0 %276 }
  0xdf   : > { %v337_v10 = vadd.f32 %v317_v59, %v277_v60  ;;  %v373_v55 = vrot.slane %v344_v37, %v372_v36 }
  0xe1   : > { %v320_v61 = vpop.xlane.xlu1 %319  ;;  %v345_v29 = vmul.f32 0.00390625, %v337_v10 }
  0xe2   : > { %v280_v62 = vpop.xlane.xlu0 %279 }
  0xe3   : > { %v338_v12 = vadd.f32 %v320_v61, %v280_v62  ;;  %v378_v49 = vrot.slane %v345_v29, %v377_v28 }
  0xe5   : > { %v323_v0 = vpop.xlane.xlu1 %322  ;;  %v346_v34 = vmul.f32 0.00390625, %v338_v12  ;;  %v380_v61 = vsel %vm379_vm1, %v378_v49, %v373_v55 }
  0xe6   : > { %v283_v1 = vpop.xlane.xlu0 %282 }
  0xe7   : > { %v339_v18 = vadd.f32 %v323_v0, %v283_v1  ;;  %v385_v53 = vrot.slane %v346_v34, %v384_v31 }
  0xe9   : > { %v326_v5 = vpop.xlane.xlu1 %325  ;;  %v347_v41 = vmul.f32 0.00390625, %v339_v18  ;;  %v387_v1 = vsel %vm386_vm2, %v385_v53, %v380_v61 }
  0xea   : > { %v286_v6 = vpop.xlane.xlu0 %285 }
  0xeb   : > { %v340_v23 = vadd.f32 %v326_v5, %v286_v6  ;;  %v392_v56 = vrot.slane %v347_v41, %v391_v40 }
  0xed   : > { %v329_v19 = vpop.xlane.xlu1 %328  ;;  %v348_v46 = vmul.f32 0.00390625, %v340_v23  ;;  %v394_v5 = vsel %vm393_vm3, %v392_v56, %v387_v1 }
  0xee   : > { %v289_v25 = vpop.xlane.xlu0 %288 }
  0xef   : > { %v341_v30 = vadd.f32 %v329_v19, %v289_v25  ;;  %v399_v59 = vrot.slane %v348_v46, %v398_v43 }
  0xf1   : > { %v332_v42 = vpop.xlane.xlu1 %331  ;;  %v349_v50 = vmul.f32 0.00390625, %v341_v30  ;;  %v401_v7 = vsel %vm400_vm4, %v399_v59, %v394_v5  ;;  %v584_v30 = vsub.s32 0, %v1321_v13 }
  0xf2   : > { %v292_v48 = vpop.xlane.xlu0 %291 }
  0xf3   : > { %v342_v51 = vadd.f32 %v332_v42, %v292_v48  ;;  %v406_v62 = vrot.slane %v349_v50, %v405_v47 }
  0xf5   : > { %v350_v57 = vmul.f32 0.00390625, %v342_v51  ;;  %v335_v58 = vpop.xlane.xlu1 %334  ;;  %v408_v10 = vsel %vm407_vm5, %v406_v62, %v401_v7 }
  0xf6   : > { %v295_v60 = vpop.xlane.xlu0 %294 }
  0xf7   : > { %v343_v0 = vadd.f32 %v335_v58, %v295_v60  ;;  %v413_v3 = vrot.slane %v350_v57, %v412_v54 }
  0xf9   : > { %v351_v6 = vmul.f32 0.00390625, %v343_v0  ;;  %v415_v12 = vsel %vm414_vm6, %v413_v3, %v408_v10 }
  0xfb   : > { %v420_v11 = vrot.slane %v351_v6, %v419_v63 }
  0xfd   : > { %v422_v16 = vsel %vm421_vm7, %v420_v11, %v415_v12 }
  0xfe   : > { %812 = vmatmul.mubr.msk.f32.vlgmr.msra.gmra.mxu0 %vm423_vm8, %v422_v16 }
 0x1be   : > { %v492_v18 = vpop.f32.mrf.mxu0 }
 0x1bf   : > { %v496_v19 = vmax.f32 %v492_v18, 0.0 }
 0x1c0   : > { %v813_v22 = vpop.f32.mrf.mxu0 }
 0x1c1   : > { %817 = vmatmul.mubr.msk.f32.vlgmr.msra.gmra.mxu1 %vm498_vm10, %v496_v19 }
 0x281   : > { %v572_v23 = vpop.f32.mrf.mxu1 }
 0x282   : > { %v775_v24 = vmul.f32 -1.442695, %v572_v23 }
 0x283   : > { %v818_v25 = vpop.f32.mrf.mxu1 }
 0x284   : > { %876 = vpow2.f32 %v775_v24 }
 0x291   : > { %v877_v28 = vpop.eup %876 }
 0x292   : > { %v579_v29 = vadd.f32 1.0, %v877_v28 }
 0x294   : > { %878 = vrcp.f32 %v579_v29 }
 0x2a1   : > { %v879_v31 = vpop.eup %878 }
 0x2a2   : > { %v585_v34 = vrot.slane %v879_v31, %v584_v30 }
 0x2a4   : > { %591 = vbcast.lane.b32.xlu1 %v585_v34, 264  ;;  %587 = vbcast.lane.b32.xlu0 %v585_v34, 256 }
 0x2a8   : > { %595 = vbcast.lane.b32.xlu1 %v585_v34, 272  ;;  %603 = vbcast.lane.b32.xlu0 %v585_v34, 288 }
 0x2ac   : > { %599 = vbcast.lane.b32.xlu1 %v585_v34, 280  ;;  %611 = vbcast.lane.b32.xlu0 %v585_v34, 304 }
 0x2b0   : > { %607 = vbcast.lane.b32.xlu1 %v585_v34, 296 }
 0x2b4   : > { %615 = vbcast.lane.b32.xlu1 %v585_v34, 312 }
 0x316   : > { %v592_v35 = vpop.permute.xlu1 %591  ;;  %v588_v36 = vpop.permute.xlu0 %587 }
 0x317   : > { %v619_v37 = vmul.f32 %v592_v35, %v1230_v8  ;;  %v620_v40 = vmul.f32 %v592_v35, %v1233_v9  ;;  %v617_v41 = vmul.f32 %v588_v36, %v1220_v2  ;;  %v618_v13 = vmul.f32 %v588_v36, %v1223_v4 }
 0x319   : > { %635 = vst [vmem:[%s1340_s9 + $0x10] sm:$0xff] %v619_v37  ;;  %636 = vst [vmem:[%s1340_s9 + $0x18] sm:$0xff] %v620_v40 }
 0x31a   : > { %633 = vst [vmem:[%s1340_s9] sm:$0xff] %v617_v41  ;;  %634 = vst [vmem:[%s1340_s9 + $0x8] sm:$0xff] %v618_v13  ;;  %v596_v8 = vpop.permute.xlu1 %595  ;;  %v604_v9 = vpop.permute.xlu0 %603 }
 0x31b   : > { %v621_v2 = vmul.f32 %v596_v8, %v1240_v14  ;;  %v622_v4 = vmul.f32 %v596_v8, %v1243_v15  ;;  %v625_v42 = vmul.f32 %v604_v9, %v1260_v26  ;;  %v626_v43 = vmul.f32 %v604_v9, %v1263_v27 }
 0x31d   : > { %637 = vst [vmem:[%s1340_s9 + $0x20] sm:$0xff] %v621_v2  ;;  %638 = vst [vmem:[%s1340_s9 + $0x28] sm:$0xff] %v622_v4 }
 0x31e   : > { %641 = vst [vmem:[%s1340_s9 + $0x40] sm:$0xff] %v625_v42  ;;  %642 = vst [vmem:[%s1340_s9 + $0x48] sm:$0xff] %v626_v43  ;;  %v600_v46 = vpop.permute.xlu1 %599  ;;  %v612_v47 = vpop.permute.xlu0 %611 }
 0x31f   : > { %v623_v14 = vmul.f32 %v600_v46, %v1250_v20  ;;  %v624_v48 = vmul.f32 %v600_v46, %v1253_v21  ;;  %v629_v15 = vmul.f32 %v612_v47, %v1280_v38  ;;  %v630_v26 = vmul.f32 %v612_v47, %v1283_v39 }
 0x321   : > { %639 = vst [vmem:[%s1340_s9 + $0x30] sm:$0xff] %v623_v14  ;;  %640 = vst [vmem:[%s1340_s9 + $0x38] sm:$0xff] %v624_v48 }
 0x322   : > { %645 = vst [vmem:[%s1340_s9 + $0x60] sm:$0xff] %v629_v15  ;;  %646 = vst [vmem:[%s1340_s9 + $0x68] sm:$0xff] %v630_v26  ;;  %v608_v27 = vpop.permute.xlu1 %607 }
 0x323   : > { %v627_v49 = vmul.f32 %v608_v27, %v1270_v32  ;;  %v628_v50 = vmul.f32 %v608_v27, %v1273_v33 }
 0x325   : > { %643 = vst [vmem:[%s1340_s9 + $0x50] sm:$0xff] %v627_v49  ;;  %644 = vst [vmem:[%s1340_s9 + $0x58] sm:$0xff] %v628_v50 }
 0x326   : > { %v616_v20 = vpop.permute.xlu1 %615 }
 0x327   : > { %v631_v21 = vmul.f32 %v616_v20, %v1290_v44  ;;  %v632_v32 = vmul.f32 %v616_v20, %v1293_v45 }
 0x329   : > { %647 = vst [vmem:[%s1340_s9 + $0x70] sm:$0xff] %v631_v21  ;;  %648 = vst [vmem:[%s1340_s9 + $0x78] sm:$0xff] %v632_v32 }
 0x32a   : > { %949 = shalt.err (!%p946_p4)
}
 0x32b   : > { %s950_s11 = scalar_lea.hbm %s1371_s29, 2048  ;;  %s954_s26 = scalar_lea.hbm %s1424_s4, 4096 }
 0x32c   : > { %p951_p9 = scmp.ne.s32.totalorder %s1371_s29, %s950_s11  ;;  %p955_p5 = scmp.lt.s32.totalorder %s1371_s29, %s1424_s4 }
 0x32d   : > { %p956_p8 = scmp.lt.s32.totalorder %s954_s26, %s950_s11 }
 0x32e   : > { %p952_p11 = pnand %p951_p9, %p1434_p1 }
 0x32f   : > { %p957_p6 = por %p956_p8, %p955_p5 }
 0x330   : > { %p953_p3 = pneg %p952_p11 }
 0x332   : > { %p958_p13 = pnand %p957_p6, %p953_p3 }
 0x334   : > { %961 = shalt.err (!%p958_p13)
}
 0x335   : > { %s1013_s9 = smov 256   ;;  %s1014_s14 = smov 16  }
 0x336   : > { %823 = dma.vmem_to_hbm [thread:$0]  (%p1434_p1), %s1373_s8, 2048, %s1371_s29, %s650_s19, %s1013_s9, %s1013_s9, %s1014_s14  }
 0x337 PF: > { %s678_s23 = sand.u32 1, %s992_s15   ;;  %p1435_p12 = scmp.ne.s32.totalorder %s1430_s28, 0 }
 0x338   : > { %p1436_p7 = scmp.ge.s32.totalorder %s1004_s18, 2  ;;  %s679_s25 = scalar_lea.sflag [#allocation4], %s678_s23 }
 0x33a   : > { %p833_p10 = pnand %p1436_p7, %p1435_p12 }
 0x33c   : > { %p834_p0 = pneg %p833_p10 }
 0x33e   : > { %987 = dma.done.wait (%p834_p0), %s679_s25, 2048  }
 0x33f   : > { %989 = vsyncadd (%p834_p0), %s679_s25, 4294965248  ;;  %p20_p2 = scmp.ge.s32.totalorder %s1065_s21, 4   ;;  %s1437_s15 = smov %s996_s16 }
 0x340   : > { %s1438_s16 = smov %s1000_s17  ;;  %s1439_s17 = smov %s1077_s24 }
 0x341   : > { %s1440_s18 = smov %s1065_s21  ;;  %22 = sbr.rel (!%p20_p2) target bundleno = 7 (0x7), region = 94 }
 0x346   :  { %684 = vsyncpa [#allocation3], 1 }
 0x347   :  { %686 = vsyncpa [#allocation3 + $0x1], 1 }
 0x348   :  { %687 = vsyncpa [#allocation6], 1 }
 0x349   :  { %689 = vsyncpa [#allocation6 + $0x1], 1 }
 0x34a   :  { %690 = vsyncpa [#allocation4], 1 }
 0x34b   :  { %692 = vsyncpa [#allocation4 + $0x1], 1 }

</bundles_post_ra>
